<compile_context>
chip_gen: v7x
topology: tpu7x:2x2x1
jax: 0.10.0
libtpu: 0.0.40
codegen_flags: <defaults>
</compile_context>

<pallas_src>
import jax
import jax.numpy as jnp
from jax.experimental import pallas as pl
from jax.experimental.pallas import tpu as pltpu

IN_FEATURES = 128
OUT_FEATURES = 256

TM_MAX = 512    # large tile: ~85%+ of HBM roofline, far under VMEM limits
TM_MIN = 128    # smallest tile we bother gridding with
TINY_B = 8      # at/below this, take the no-grid whole-VMEM path


def linear_relu_kernel(x_ref, w_ref, b_ref, o_ref):
    # Feed the MXU in the weight's dtype (identity cast if w is f32, free VPU
    # cast if bf16); accumulate in f32; bias-add + ReLU in f32; cast at store.
    x = x_ref[...].astype(w_ref.dtype)                        # (tm, 128)
    acc = jnp.dot(x, w_ref[...],
                  preferred_element_type=jnp.float32)         # (tm, 256) f32
    y = acc + b_ref[...].astype(jnp.float32)                  # bias broadcast
    o_ref[...] = jnp.maximum(y, 0.0).astype(o_ref.dtype)      # ReLU


def _cost_estimate(B, x, w, b, out_dtype):
    flops = 2 * B * IN_FEATURES * OUT_FEATURES
    bytes_accessed = (x.size * x.dtype.itemsize
                      + w.size * w.dtype.itemsize
                      + b.size * b.dtype.itemsize
                      + B * OUT_FEATURES * jnp.dtype(out_dtype).itemsize)
    return pl.CostEstimate(flops=flops, transcendentals=0,
                           bytes_accessed=bytes_accessed)


def _choose_tm(B):
    """Largest tile <= TM_MAX, shrunk so the grid has >= 2 steps when possible
    (keeps both v7x TensorCores busy on the 'parallel' axis)."""
    tm = TM_MAX
    while tm > TM_MIN and pl.cdiv(B, tm) < 2:
        tm //= 2
    return tm


def linear_relu(x, w, b, out_dtype=jnp.float32):
    """y = relu(x @ w + b).

    x: (B, 128) f32 or bf16, w: (128, 256) f32 or bf16, b: (1, 256) f32.
    """
    B = x.shape[0]
    out_shape = jax.ShapeDtypeStruct((B, OUT_FEATURES), out_dtype)
    cost = _cost_estimate(B, x, w, b, out_dtype)

    if B <= TINY_B:
        # Tiny-batch path (the spec's (1, 128) input): no grid, whole arrays
        # in VMEM, no pipeline machinery.
        return pl.pallas_call(
            linear_relu_kernel,
            out_shape=out_shape,
            in_specs=[pl.BlockSpec(memory_space=pltpu.MemorySpace.VMEM)] * 3,
            out_specs=pl.BlockSpec(memory_space=pltpu.MemorySpace.VMEM),
            cost_estimate=cost,
        )(x, w, b)

    # Batched path: cdiv grid over M-tiles (last tile padded/clipped by
    # Pallas — row-wise independent compute, so padded rows are simply not
    # written back). Weight/bias index_maps are constant, so the weight is
    # DMA'd once and stays resident in VMEM; "parallel" lets v7x megacore
    # shard rows across its two TensorCores.
    tm = _choose_tm(B)
    return pl.pallas_call(
        linear_relu_kernel,
        out_shape=out_shape,
        grid=(pl.cdiv(B, tm),),
        in_specs=[
            pl.BlockSpec((tm, IN_FEATURES), lambda i: (i, 0)),
            pl.BlockSpec((IN_FEATURES, OUT_FEATURES), lambda i: (0, 0)),
            pl.BlockSpec((1, OUT_FEATURES), lambda i: (0, 0)),
        ],
        out_specs=pl.BlockSpec((tm, OUT_FEATURES), lambda i: (i, 0)),
        compiler_params=pltpu.CompilerParams(
            dimension_semantics=("parallel",)),
        cost_estimate=cost,
    )(x, w, b)


if __name__ == "__main__":
    key = jax.random.PRNGKey(0)
    k_x, k_w, k_b, k_big = jax.random.split(key, 4)

    # Input consistent with the PyTorch module: x1 = torch.randn(1, 128)
    x1 = jax.random.normal(k_x, (1, IN_FEATURES), dtype=jnp.float32)

    # nn.Linear-style init: uniform(-1/sqrt(fan_in), 1/sqrt(fan_in)).
    # Keep the weight in f32 for bit-faithful Linear semantics (bf16
    # streaming is supported by the kernel but is an accuracy tradeoff).
    bound = 1.0 / jnp.sqrt(IN_FEATURES)
    w = jax.random.uniform(k_w, (IN_FEATURES, OUT_FEATURES),
                           dtype=jnp.float32, minval=-bound, maxval=bound)
    b = jax.random.uniform(k_b, (1, OUT_FEATURES),
                           dtype=jnp.float32, minval=-bound, maxval=bound)

    # --- Tiny-batch (spec) case: B = 1 ---
    out = linear_relu(x1, w, b)
    jax.block_until_ready(out)
    assert out.shape == (1, OUT_FEATURES)
    ref = jnp.maximum(x1 @ w + b, 0.0)
    assert jnp.allclose(out, ref, atol=1e-5, rtol=1e-5)

    # --- Batched path sanity check (ragged B exercises the cdiv grid) ---
    B_big = 640  # not a multiple of 512 -> last tile is padded/clipped
    x_big = jax.random.normal(k_big, (B_big, IN_FEATURES), dtype=jnp.float32)
    out_big = linear_relu(x_big, w, b)
    jax.block_until_ready(out_big)
    assert out_big.shape == (B_big, OUT_FEATURES)
    ref_big = jnp.maximum(x_big @ w + b, 0.0)
    assert jnp.allclose(out_big, ref_big, atol=1e-4, rtol=1e-4)

    print("KERNEL_OK")
</pallas_src>

<mosaic_0001>
module attributes {stable_mosaic.version = 11 : i64} {
  func.func @linear_relu_kernel(%arg0: memref<1x128xf32, #tpu.memory_space<vmem>>, %arg1: memref<128x256xf32, #tpu.memory_space<vmem>>, %arg2: memref<1x256xf32, #tpu.memory_space<vmem>>, %arg3: memref<1x256xf32, #tpu.memory_space<vmem>>) attributes {dimension_semantics = [], scalar_prefetch = 0 : i64, scratch_operands = 0 : i64, tpu.core_type = #tpu.core_type<tc>} {
    %c0 = arith.constant 0 : index
    %c0_0 = arith.constant 0 : index
    %0 = vector.load %arg0[%c0, %c0_0] : memref<1x128xf32, #tpu.memory_space<vmem>>, vector<1x128xf32>
    %c0_1 = arith.constant 0 : index
    %c0_2 = arith.constant 0 : index
    %1 = vector.load %arg1[%c0_1, %c0_2] : memref<128x256xf32, #tpu.memory_space<vmem>>, vector<128x256xf32>
    %cst = arith.constant dense<0.000000e+00> : vector<1x256xf32>
    %2 = tpu.matmul %0, %1, %cst {dimension_numbers = #tpu.dot_dimension_numbers<[1], [0], [0], [1], [0, 0, 1, 1], [], []>} : vector<1x128xf32>, vector<128x256xf32>, vector<1x256xf32> -> vector<1x256xf32>
    %c0_3 = arith.constant 0 : index
    %c0_4 = arith.constant 0 : index
    %3 = vector.load %arg2[%c0_3, %c0_4] : memref<1x256xf32, #tpu.memory_space<vmem>>, vector<1x256xf32>
    %4 = arith.addf %2, %3 : vector<1x256xf32>
    %cst_5 = arith.constant 0.000000e+00 : f32
    %5 = vector.broadcast %cst_5 : f32 to vector<1x256xf32>
    %6 = arith.maximumf %4, %5 : vector<1x256xf32>
    %c0_6 = arith.constant 0 : index
    %c0_7 = arith.constant 0 : index
    %7 = vector.load %arg3[%c0_6, %c0_7] : memref<1x256xf32, #tpu.memory_space<vmem>>, vector<1x256xf32>
    tpu.vector_store %arg3[%c0_6, %c0_7], %6 {strides = array<i32>} : memref<1x256xf32, #tpu.memory_space<vmem>>, vector<1x256xf32>,
    return
  }
}

</mosaic_0001>

<bundles_post_ra>
// kernel: tpu_custom_call.1
= control target key start
LH: loop header
LB: loop body
LE: loop exit
PB: predicated region body
PF: predicated region fallthrough
CT: control target
= control target key end

     0   :  { %8 = vsyncpa [#allocation3], 0  ;;  %s382_s0 = inlined_call_operand.hbm [shape: f32[1,128], index: 0, kind: input, shape index: {}]   ;;  %s383_s1 = inlined_call_operand.hbm [shape: f32[128,256], index: 1, kind: input, shape index: {}]   ;;  %s384_s2 = inlined_call_operand.vmem [shape: f32[1,256], index: 2, kind: input, shape index: {}]   ;;  %s385_s3 = inlined_call_operand.hbm [shape: f32[1,256], index: 3, kind: output, shape index: {}]  }
   0x1   :  { %9 = vsyncpa [#allocation6], 0 }
   0x2   :  { %10 = vsyncpa [#allocation4], 0  ;;  %s309_s12 = smov [#allocation2]   ;;  %s310_s14 = smov [#allocation5]  }
   0x3   :  { %s17_s13 = sshll.u32 %s309_s12, 4  ;;  %s26_s15 = sshll.u32 %s310_s14, 4  ;;  %s18_s13 = int_to_ptr.vmem [resolvable:$true] %s17_s13  ;;  %s336_s15 = int_to_ptr.vmem [resolvable:$true] %s26_s15 }
   0x4   :  { %s237_s18 = scalar_lea.hbm %s382_s0, 16 }
   0x5   :  { %p238_p0 = scmp.ne.s32.totalorder %s382_s0, %s237_s18  ;;  %p241_p1 = scmp.lt.u32.totalorder %s237_s18, %s382_s0 }
   0x7   :  { %p243_p2 = pnand %p241_p1, %p238_p0 }
   0x9   :  { %246 = shalt.err (!%p243_p2)
}
   0xa   :  { %s247_s23 = scalar_lea.vmem %s18_s13, 16  ;;  %s251_s24 = scalar_lea.vmem %s18_s13, 32 }
   0xb   :  { %p248_p3 = scmp.ne.s32.totalorder %s18_s13, %s247_s23  ;;  %p252_p4 = scmp.lt.s32.totalorder %s18_s13, %s18_s13 }
   0xc   :  { %p253_p5 = scmp.lt.s32.totalorder %s251_s24, %s247_s23 }
   0xe   :  { %p254_p6 = por %p253_p5, %p252_p4 }
  0x10   :  { %p255_p7 = pnand %p254_p6, %p248_p3 }
  0x12   :  { %258 = shalt.err (!%p255_p7)
}
  0x13   :  { %20 = dma.hbm_to_vmem [thread:$0]  %s382_s0, 16, %s18_s13, [#allocation3]  }
  0x14   :  { %s259_s29 = scalar_lea.hbm %s383_s1, 4096 }
  0x15   :  { %p260_p8 = scmp.ne.s32.totalorder %s383_s1, %s259_s29  ;;  %p263_p9 = scmp.lt.u32.totalorder %s259_s29, %s383_s1 }
  0x17   :  { %p265_p10 = pnand %p263_p9, %p260_p8 }
  0x19   :  { %268 = shalt.err (!%p265_p10)
}
  0x1a   :  { %s269_s7 = scalar_lea.vmem %s336_s15, 4096  ;;  %p274_p12 = scmp.lt.s32.totalorder %s336_s15, %s336_s15 }
  0x1b   :  { %p270_p11 = scmp.ne.s32.totalorder %s336_s15, %s269_s7  ;;  %p275_p13 = scmp.lt.s32.totalorder %s269_s7, %s269_s7 }
  0x1d   :  { %p276_p0 = por %p275_p13, %p274_p12 }
  0x1f   :  { %p277_p1 = pnand %p276_p0, %p270_p11 }
  0x21   :  { %280 = shalt.err (!%p277_p1)
}
  0x22   :  { %s311_s0 = smov 256   ;;  %s312_s8 = smov 16  }
  0x23   :  { %32 = dma.hbm_to_vmem [thread:$0]  %s383_s1, 4096, %s336_s15, [#allocation6], %s311_s0, %s311_s0, %s312_s8  }
  0x24   :  { %303 = dma.done.wait [#allocation3], 16  }
  0x25   :  { %304 = vsyncadd [#allocation3], 4294967280 }
  0x26   :  { %305 = dma.done.wait [#allocation6], 4096  }
  0x27   :  { %306 = vsyncadd [#allocation6], 4294963200  ;;  %v313_v0 = vmov 0.0   ;;  %v43_v1 = vld [vmem:[#allocation5 + $0x8] sm:$0xff]  ;;  %v45_v2 = vld [vmem:[#allocation5 + $0x18] sm:$0xff]  ;;  %v76_v50 = vlaneseq  ;;  %s315_s12 = smov [#allocation7]  }
  0x28   :  { %150 = vmatprep.mubr.f32.mxu0 %v313_v0  ;;  %v42_v3 = vld [vmem:[#allocation5] sm:$0xff]  ;;  %v198_v4 = vpack.c.bf16 %v45_v2, %v43_v1  ;;  %v44_v5 = vld [vmem:[#allocation5 + $0x10] sm:$0xff]  ;;  %v47_v6 = vld [vmem:[#allocation5 + $0x28] sm:$0xff]  ;;  %v314_v55 = vmov 1966171168   ;;  %s188_s13 = sshll.u32 %s315_s12, 4  ;;  %s189_s13 = int_to_ptr.vmem [resolvable:$true] %s188_s13 }
  0x29   :  { %v49_v7 = vld [vmem:[#allocation5 + $0x38] sm:$0xff]  ;;  %v200_v8 = vpack.c.bf16 %v44_v5, %v42_v3  ;;  %v46_v10 = vld [vmem:[#allocation5 + $0x20] sm:$0xff]  ;;  %v48_v11 = vld [vmem:[#allocation5 + $0x30] sm:$0xff]  ;;  %v77_v51 = vshrl.u32 %v76_v50, 7  ;;  %v163_v56 = vunpack.c.l.s4 %v314_v55  ;;  %vm179_vm0 = vcmp.lt.s32.totalorder %v76_v50, 256  ;;  %p286_p3 = scmp.lt.s32.totalorder %s189_s13, %s189_s13 }
  0x2a   :  { %v202_v9 = vpack.c.bf16 %v49_v7, %v47_v6  ;;  %v51_v12 = vld [vmem:[#allocation5 + $0x48] sm:$0xff]  ;;  %199 = vmatprep.subr.bf16.mxu0 %v198_v4  ;;  %v53_v13 = vld [vmem:[#allocation5 + $0x58] sm:$0xff]  ;;  %v204_v14 = vpack.c.bf16 %v48_v11, %v46_v10  ;;  %v50_v16 = vld [vmem:[#allocation5 + $0x40] sm:$0xff] }
  0x2b   :  { %201 = vmatpush1.bf16.msra.mxu0 %v200_v8  ;;  %v206_v15 = vpack.c.bf16 %v53_v13, %v51_v12  ;;  %v52_v17 = vld [vmem:[#allocation5 + $0x50] sm:$0xff]  ;;  %v55_v18 = vld [vmem:[#allocation5 + $0x68] sm:$0xff]  ;;  %v57_v19 = vld [vmem:[#allocation5 + $0x78] sm:$0xff]  ;;  %v78_v52 = vsub.s32 0, %v77_v51  ;;  %v82_v54 = vsub.s32 1, %v77_v51  ;;  %v164_v60 = vunpack.c.0.s8 %v163_v56 }
  0x2c   :  { %203 = vmatprep.subr.bf16.mxu0 %v202_v9  ;;  %v208_v20 = vpack.c.bf16 %v52_v17, %v50_v16  ;;  %v210_v21 = vpack.c.bf16 %v57_v19, %v55_v18  ;;  %v54_v22 = vld [vmem:[#allocation5 + $0x60] sm:$0xff]  ;;  %v56_v23 = vld [vmem:[#allocation5 + $0x70] sm:$0xff]  ;;  %v59_v24 = vld [vmem:[#allocation5 + $0x88] sm:$0xff] }
  0x2d   :  { %v61_v25 = vld [vmem:[#allocation5 + $0x98] sm:$0xff]  ;;  %v212_v26 = vpack.c.bf16 %v56_v23, %v54_v22  ;;  %v58_v28 = vld [vmem:[#allocation5 + $0x80] sm:$0xff]  ;;  %v60_v29 = vld [vmem:[#allocation5 + $0x90] sm:$0xff]  ;;  %v167_v2 = vsub.s32 %v164_v60, %v77_v51 }
  0x2e   :  { %v214_v27 = vpack.c.bf16 %v61_v25, %v59_v24  ;;  %v63_v30 = vld [vmem:[#allocation5 + $0xa8] sm:$0xff]  ;;  %v65_v31 = vld [vmem:[#allocation5 + $0xb8] sm:$0xff]  ;;  %v216_v32 = vpack.c.bf16 %v60_v29, %v58_v28  ;;  %v62_v34 = vld [vmem:[#allocation5 + $0xa0] sm:$0xff] }
  0x2f   :  { %205 = vmatpush1.bf16.msra.mxu0 %v204_v14  ;;  %v218_v33 = vpack.c.bf16 %v65_v31, %v63_v30  ;;  %v64_v35 = vld [vmem:[#allocation5 + $0xb0] sm:$0xff]  ;;  %v67_v36 = vld [vmem:[#allocation5 + $0xc8] sm:$0xff]  ;;  %v69_v37 = vld [vmem:[#allocation5 + $0xd8] sm:$0xff] }
  0x30   :  { %207 = vmatprep.subr.bf16.mxu0 %v206_v15  ;;  %v220_v38 = vpack.c.bf16 %v64_v35, %v62_v34  ;;  %v222_v39 = vpack.c.bf16 %v69_v37, %v67_v36  ;;  %v66_v40 = vld [vmem:[#allocation5 + $0xc0] sm:$0xff]  ;;  %v68_v41 = vld [vmem:[#allocation5 + $0xd0] sm:$0xff]  ;;  %v71_v42 = vld [vmem:[#allocation5 + $0xe8] sm:$0xff] }
  0x31   :  { %v73_v43 = vld [vmem:[#allocation5 + $0xf8] sm:$0xff]  ;;  %v224_v44 = vpack.c.bf16 %v68_v41, %v66_v40  ;;  %v70_v46 = vld [vmem:[#allocation5 + $0xe0] sm:$0xff]  ;;  %v72_v47 = vld [vmem:[#allocation5 + $0xf0] sm:$0xff] }
  0x32   :  { %v226_v45 = vpack.c.bf16 %v73_v43, %v71_v42  ;;  %v228_v48 = vpack.c.bf16 %v72_v47, %v70_v46  ;;  %v41_v49 = vld [vmem:[#allocation2] sm:$0x1]  ;;  %v74_v53 = vld [vmem:[%s384_s2] sm:$0x3]  ;;  %s281_s2 = scalar_lea.vmem %s189_s13, 32 }
  0x33   :  { %209 = vmatpush1.bf16.msra.mxu0 %v208_v20  ;;  %v79_v57 = vrot.slane %v74_v53, %v78_v52  ;;  %v83_v58 = vrot.slane %v74_v53, %v82_v54  ;;  %p282_p2 = scmp.ne.s32.totalorder %s189_s13, %s281_s2  ;;  %p287_p4 = scmp.lt.s32.totalorder %s281_s2, %s281_s2 }
  0x34   :  { %211 = vmatprep.subr.bf16.mxu0 %v210_v21 }
  0x35   :  { %p288_p5 = por %p287_p4, %p286_p3 }
  0x37   :  { %213 = vmatpush1.bf16.msra.mxu0 %v212_v26  ;;  %p289_p6 = pnand %p288_p5, %p282_p2 }
  0x38   :  { %215 = vmatprep.subr.bf16.mxu0 %v214_v27 }
  0x3b   :  { %217 = vmatpush1.bf16.msra.mxu0 %v216_v32 }
  0x3c   :  { %219 = vmatprep.subr.bf16.mxu0 %v218_v33 }
  0x3f   :  { %221 = vmatpush1.bf16.msra.mxu0 %v220_v38 }
  0x40   :  { %223 = vmatprep.subr.bf16.mxu0 %v222_v39 }
  0x43   :  { %225 = vmatpush1.bf16.msra.mxu0 %v224_v44 }
  0x44   :  { %227 = vmatprep.subr.bf16.mxu0 %v226_v45 }
  0x47   :  { %229 = vmatpush1.bf16.msra.mxu0 %v228_v48 }
  0x4a   :  { %151 = vmatmul.mubr.f32.vlgmr.msra.gmra.mrb[0].mxu0 %v41_v49 }
 0x11d   :  { %v152_v59 = vpop.f32.mrb[0].mxu0 }
 0x11e   :  { %v153_v61 = vadd.f32 %v152_v59, %v79_v57  ;;  %v154_v62 = vpop.f32.mrb[1].mxu0 }
 0x11f   :  { %v155_v63 = vadd.f32 %v154_v62, %v83_v58 }
 0x120   :  { %v157_v0 = vmax.f32 %v153_v61, 0.0 }
 0x121   :  { %v158_v1 = vmax.f32 %v155_v63, 0.0 }
 0x123   :  { %v161_v3 = vcombine.low %v157_v0, %v158_v1 }
 0x125   :  { %v168_v4 = vrot.slane %v161_v3, %v167_v2 }
 0x127   :  { %v175_v5 = vrot.slane %v168_v4, %v167_v2 }
 0x129   :  { %181 = vst.msk [vmem:[#allocation7] sm:$0x3] %vm179_vm0, %v175_v5 }
 0x12a   :  { %292 = shalt.err (!%p289_p6)
}
 0x12b   :  { %s293_s16 = scalar_lea.hbm %s385_s3, 32 }
 0x12c   :  { %p294_p7 = scmp.ne.s32.totalorder %s385_s3, %s293_s16  ;;  %p297_p8 = scmp.lt.u32.totalorder %s293_s16, %s385_s3 }
 0x12e   :  { %p299_p9 = pnand %p297_p8, %p294_p7 }
 0x130   :  { %302 = shalt.err (!%p299_p9)
}
 0x131   :  { %191 = dma.vmem_to_hbm [thread:$0]  %s189_s13, 32, %s385_s3, [#allocation4]  }
 0x132   :  { %307 = dma.done.wait [#allocation4], 32  }
 0x133   :  { %308 = vsyncadd [#allocation4], 4294967264 }
 0x134   :  { %195 = vsyncpa [#allocation3], 1 }
 0x135   :  { %196 = vsyncpa [#allocation6], 1 }
 0x136   :  { %197 = vsyncpa [#allocation4], 1 }

</bundles_post_ra>
